<compile_context>
chip_gen: v7x
topology: tpu7x:2x2x1
jax: 0.10.0
libtpu: 0.0.40
codegen_flags: <defaults>
</compile_context>

<pallas_src>
import jax
import jax.numpy as jnp
from jax.experimental import pallas as pl
from jax.experimental.pallas import tpu as pltpu


def _dm_kernel(doc_ids_ref, ctx_ids_ref, smp_ids_ref,   # VMEM int32 id blocks
               para_ref, word_ref, out_ref,             # VMEM f32 tables
               o_ref):                                   # VMEM f32 (TB, S_pad)
    TB = doc_ids_ref.shape[0]
    n_docs, D = para_ref.shape
    n_words = word_ref.shape[0]
    C = ctx_ids_ref.shape[1]
    S = smp_ids_ref.shape[1]
    S_pad = o_ref.shape[1]
    f32 = jnp.float32

    # ---- doc row gather as a one-hot matmul on the MXU -------------------
    doc_ids = doc_ids_ref[...]                                       # (TB, 1)
    doc_iota = jax.lax.broadcasted_iota(jnp.int32, (TB, n_docs), 1)
    doc_oh = (doc_ids == doc_iota).astype(f32)                       # (TB, n_docs)
    doc_vec = jnp.dot(doc_oh, para_ref[...],
                      preferred_element_type=f32)                    # (TB, D)

    # ---- context gather + sum fused: per-row word counts, one matmul ------
    ctx_ids = ctx_ids_ref[...]                                       # (TB, C)
    word_iota = jax.lax.broadcasted_iota(jnp.int32, (TB, n_words), 1)
    ctx_counts = (ctx_ids[:, 0:1] == word_iota).astype(f32)          # (TB, NW)
    for c in range(1, C):  # C is small & static: C-1 VPU adds, no relayout
        ctx_counts = ctx_counts + (ctx_ids[:, c:c + 1] == word_iota).astype(f32)
    ctx_sum = jnp.dot(ctx_counts, word_ref[...],
                      preferred_element_type=f32)                    # (TB, D)

    inputs = doc_vec + ctx_sum                                       # (TB, D)

    # ---- score all words, then one-hot-select the sampled columns ---------
    # proj[b, n] = inputs[b, :] . outputs[:, n]  (native (D, NW) layout,
    # so no transposed copy of the output table is ever made).
    proj = jnp.dot(inputs, out_ref[...], preferred_element_type=f32)  # (TB, NW)

    smp_ids = smp_ids_ref[...]                                       # (TB, S)
    smp_iota = jax.lax.broadcasted_iota(jnp.int32, (TB, S, n_words), 2)
    smp_oh = (smp_ids[:, :, None] == smp_iota).astype(f32)           # (TB,S,NW)
    res = jnp.sum(smp_oh * proj[:, None, :], axis=-1)                # (TB, S)

    # ---- lane-dense store: pad the last dim up to a multiple of 128 -------
    if S_pad > S:
        res = jnp.concatenate(
            [res, jnp.zeros((TB, S_pad - S), f32)], axis=1)
    o_ref[...] = res


def distributed_memory_forward(doc_ids, context_ids, sample_ids,
                               paragraph_matrix, word_matrix, outputs,
                               *, batch_tile=8):
    """PV-DM forward (concat=False). `outputs` stays in its native
    (vec_dim, n_words) layout — no per-call transpose."""
    B, C = context_ids.shape
    S = sample_ids.shape[1]
    n_docs, D = paragraph_matrix.shape
    n_words = word_matrix.shape[0]

    TB = batch_tile
    B_pad = ((B + TB - 1) // TB) * TB          # pad batch to a tile multiple
    S_pad = ((S + 127) // 128) * 128           # lane-dense output width

    pad_b = B_pad - B
    doc2 = jnp.pad(doc_ids.astype(jnp.int32).reshape(B, 1), ((0, pad_b), (0, 0)))
    ctx2 = jnp.pad(context_ids.astype(jnp.int32), ((0, pad_b), (0, 0)))
    smp2 = jnp.pad(sample_ids.astype(jnp.int32), ((0, pad_b), (0, 0)))

    res = pl.pallas_call(
        _dm_kernel,
        out_shape=jax.ShapeDtypeStruct((B_pad, S_pad), jnp.float32),
        grid=(B_pad // TB,),
        in_specs=[
            pl.BlockSpec((TB, 1), lambda i: (i, 0)),        # doc ids
            pl.BlockSpec((TB, C), lambda i: (i, 0)),        # context ids
            pl.BlockSpec((TB, S), lambda i: (i, 0)),        # sample ids
            pl.BlockSpec((n_docs, D), lambda i: (0, 0)),    # paragraph_matrix
            pl.BlockSpec((n_words, D), lambda i: (0, 0)),   # word_matrix
            pl.BlockSpec((D, n_words), lambda i: (0, 0)),   # outputs (native)
        ],
        out_specs=pl.BlockSpec((TB, S_pad), lambda i: (i, 0)),
        compiler_params=pltpu.CompilerParams(
            dimension_semantics=("parallel",),              # 2 TCs on v7x
            vmem_limit_bytes=64 * 1024 * 1024),              # v5e default is 16 MiB
    )(doc2, ctx2, smp2, paragraph_matrix, word_matrix, outputs)

    # Match torch's `.squeeze()` (drops ANY size-1 dim, e.g. B == 1 or S == 1).
    return jnp.squeeze(res[:B, :S])


def reference_forward(doc_ids, context_ids, sample_ids, para, words, outputs):
    """Plain-JAX transcription of DistributedMemory.forward (concat=False)."""
    word_sum = jnp.sum(words[context_ids, :], axis=1)        # (B, D)
    doc = para[doc_ids, :]                                   # (B, D)
    inputs = (doc + word_sum)[:, None, :]                    # (B, 1, D)
    out = outputs[:, sample_ids]                             # (D, B, S)
    out = jnp.transpose(out, (1, 0, 2))                      # (B, D, S)
    res = jnp.einsum('bij,bjk->bik', inputs, out,
                     precision=jax.lax.Precision.HIGHEST)    # (B, 1, S)
    return jnp.squeeze(res)                                  # (B, S)


if __name__ == "__main__":
    vec_dim, n_docs, n_words = 32, 16, 64
    B, C, S = 16, 4, 8  # batch, context window, sampled words

    key = jax.random.PRNGKey(0)
    k1, k2, k3, k4, k5, k6 = jax.random.split(key, 6)
    paragraph_matrix = jax.random.normal(k1, (n_docs, vec_dim), jnp.float32)
    word_matrix = jax.random.normal(k2, (n_words, vec_dim), jnp.float32)
    # NOTE: the PyTorch module initializes `outputs` to zeros (same shape);
    # we use randn here so the kernel result is non-trivial and checkable.
    outputs = jax.random.normal(k3, (vec_dim, n_words), jnp.float32)

    doc_ids = jax.random.randint(k4, (B,), 0, n_docs, dtype=jnp.int32)
    context_ids = jax.random.randint(k5, (B, C), 0, n_words, dtype=jnp.int32)
    sample_ids = jax.random.randint(k6, (B, S), 0, n_words, dtype=jnp.int32)

    got = distributed_memory_forward(doc_ids, context_ids, sample_ids,
                                     paragraph_matrix, word_matrix, outputs)
    got = jax.block_until_ready(got)

    want = reference_forward(doc_ids, context_ids, sample_ids,
                             paragraph_matrix, word_matrix, outputs)
    assert got.shape == (B, S), got.shape
    assert jnp.allclose(got, want, atol=1e-3, rtol=1e-3), \
        float(jnp.max(jnp.abs(got - want)))
    print("KERNEL_OK")
</pallas_src>

<mosaic_0001>
module attributes {stable_mosaic.version = 11 : i64} {
  func.func @_dm_kernel(%arg0: i32, %arg1: memref<8x1xi32, #tpu.memory_space<vmem>>, %arg2: memref<8x4xi32, #tpu.memory_space<vmem>>, %arg3: memref<8x8xi32, #tpu.memory_space<vmem>>, %arg4: memref<16x32xf32, #tpu.memory_space<vmem>>, %arg5: memref<64x32xf32, #tpu.memory_space<vmem>>, %arg6: memref<32x64xf32, #tpu.memory_space<vmem>>, %arg7: memref<8x128xf32, #tpu.memory_space<vmem>>) attributes {dimension_semantics = [#tpu.dimension_semantics<parallel>], iteration_bounds = array<i64: 2>, scalar_prefetch = 0 : i64, scratch_operands = 0 : i64, tpu.core_type = #tpu.core_type<tc>, window_params = [{transform_indices = @transform_0, window_bounds = array<i64: 8, 1>}, {transform_indices = @transform_1, window_bounds = array<i64: 8, 4>}, {transform_indices = @transform_2, window_bounds = array<i64: 8, 8>}, {pipeline_mode = #tpu.pipeline_mode<synchronous>, transform_indices = @transform_3, window_bounds = array<i64: 16, 32>}, {pipeline_mode = #tpu.pipeline_mode<synchronous>, transform_indices = @transform_4, window_bounds = array<i64: 64, 32>}, {pipeline_mode = #tpu.pipeline_mode<synchronous>, transform_indices = @transform_5, window_bounds = array<i64: 32, 64>}, {transform_indices = @transform_6, window_bounds = array<i64: 8, 128>}]} {
    %c0 = arith.constant 0 : index
    %c0_0 = arith.constant 0 : index
    %0 = vector.load %arg1[%c0, %c0_0] : memref<8x1xi32, #tpu.memory_space<vmem>>, vector<8x1xi32>
    %1 = tpu.iota {dimensions = array<i32: 1>} : vector<8x16xi32>
    %2 = vector.broadcast %0 : vector<8x1xi32> to vector<8x16xi32>
    %3 = arith.cmpi eq, %2, %1 : vector<8x16xi32>
    %4 = arith.extui %3 : vector<8x16xi1> to vector<8x16xi32>
    %5 = arith.sitofp %4 : vector<8x16xi32> to vector<8x16xf32>
    %c0_1 = arith.constant 0 : index
    %c0_2 = arith.constant 0 : index
    %6 = vector.load %arg4[%c0_1, %c0_2] : memref<16x32xf32, #tpu.memory_space<vmem>>, vector<16x32xf32>
    %cst = arith.constant dense<0.000000e+00> : vector<8x32xf32>
    %7 = tpu.matmul %5, %6, %cst {dimension_numbers = #tpu.dot_dimension_numbers<[1], [0], [0], [1], [0, 0, 1, 1], [], []>} : vector<8x16xf32>, vector<16x32xf32>, vector<8x32xf32> -> vector<8x32xf32>
    %c0_3 = arith.constant 0 : index
    %c0_4 = arith.constant 0 : index
    %8 = vector.load %arg2[%c0_3, %c0_4] : memref<8x4xi32, #tpu.memory_space<vmem>>, vector<8x4xi32>
    %9 = tpu.iota {dimensions = array<i32: 1>} : vector<8x64xi32>
    %10 = vector.extract_strided_slice %8 {offsets = [0, 0], sizes = [8, 1], strides = [1, 1]} : vector<8x4xi32> to vector<8x1xi32>
    %11 = vector.broadcast %10 : vector<8x1xi32> to vector<8x64xi32>
    %12 = arith.cmpi eq, %11, %9 : vector<8x64xi32>
    %13 = arith.extui %12 : vector<8x64xi1> to vector<8x64xi32>
    %14 = arith.sitofp %13 : vector<8x64xi32> to vector<8x64xf32>
    %15 = vector.extract_strided_slice %8 {offsets = [0, 1], sizes = [8, 1], strides = [1, 1]} : vector<8x4xi32> to vector<8x1xi32>
    %16 = vector.broadcast %15 : vector<8x1xi32> to vector<8x64xi32>
    %17 = arith.cmpi eq, %16, %9 : vector<8x64xi32>
    %18 = arith.extui %17 : vector<8x64xi1> to vector<8x64xi32>
    %19 = arith.sitofp %18 : vector<8x64xi32> to vector<8x64xf32>
    %20 = arith.addf %14, %19 : vector<8x64xf32>
    %21 = vector.extract_strided_slice %8 {offsets = [0, 2], sizes = [8, 1], strides = [1, 1]} : vector<8x4xi32> to vector<8x1xi32>
    %22 = vector.broadcast %21 : vector<8x1xi32> to vector<8x64xi32>
    %23 = arith.cmpi eq, %22, %9 : vector<8x64xi32>
    %24 = arith.extui %23 : vector<8x64xi1> to vector<8x64xi32>
    %25 = arith.sitofp %24 : vector<8x64xi32> to vector<8x64xf32>
    %26 = arith.addf %20, %25 : vector<8x64xf32>
    %27 = vector.extract_strided_slice %8 {offsets = [0, 3], sizes = [8, 1], strides = [1, 1]} : vector<8x4xi32> to vector<8x1xi32>
    %28 = vector.broadcast %27 : vector<8x1xi32> to vector<8x64xi32>
    %29 = arith.cmpi eq, %28, %9 : vector<8x64xi32>
    %30 = arith.extui %29 : vector<8x64xi1> to vector<8x64xi32>
    %31 = arith.sitofp %30 : vector<8x64xi32> to vector<8x64xf32>
    %32 = arith.addf %26, %31 : vector<8x64xf32>
    %c0_5 = arith.constant 0 : index
    %c0_6 = arith.constant 0 : index
    %33 = vector.load %arg5[%c0_5, %c0_6] : memref<64x32xf32, #tpu.memory_space<vmem>>, vector<64x32xf32>
    %cst_7 = arith.constant dense<0.000000e+00> : vector<8x32xf32>
    %34 = tpu.matmul %32, %33, %cst_7 {dimension_numbers = #tpu.dot_dimension_numbers<[1], [0], [0], [1], [0, 0, 1, 1], [], []>} : vector<8x64xf32>, vector<64x32xf32>, vector<8x32xf32> -> vector<8x32xf32>
    %35 = arith.addf %7, %34 : vector<8x32xf32>
    %c0_8 = arith.constant 0 : index
    %c0_9 = arith.constant 0 : index
    %36 = vector.load %arg6[%c0_8, %c0_9] : memref<32x64xf32, #tpu.memory_space<vmem>>, vector<32x64xf32>
    %cst_10 = arith.constant dense<0.000000e+00> : vector<8x64xf32>
    %37 = tpu.matmul %35, %36, %cst_10 {dimension_numbers = #tpu.dot_dimension_numbers<[1], [0], [0], [1], [0, 0, 1, 1], [], []>} : vector<8x32xf32>, vector<32x64xf32>, vector<8x64xf32> -> vector<8x64xf32>
    %c0_11 = arith.constant 0 : index
    %c0_12 = arith.constant 0 : index
    %38 = vector.load %arg3[%c0_11, %c0_12] : memref<8x8xi32, #tpu.memory_space<vmem>>, vector<8x8xi32>
    %39 = tpu.iota {dimensions = array<i32: 2>} : vector<8x8x64xi32>
    %40 = vector.shape_cast %38 : vector<8x8xi32> to vector<8x8x1xi32>
    %41 = vector.broadcast %40 : vector<8x8x1xi32> to vector<8x8x64xi32>
    %42 = arith.cmpi eq, %41, %39 : vector<8x8x64xi32>
    %43 = arith.extui %42 : vector<8x8x64xi1> to vector<8x8x64xi32>
    %44 = arith.sitofp %43 : vector<8x8x64xi32> to vector<8x8x64xf32>
    %45 = vector.shape_cast %37 : vector<8x64xf32> to vector<8x1x64xf32>
    %46 = vector.broadcast %45 : vector<8x1x64xf32> to vector<8x8x64xf32>
    %47 = arith.mulf %44, %46 : vector<8x8x64xf32>
    %cst_13 = arith.constant dense<0.000000e+00> : vector<8x8xf32>
    %48 = vector.multi_reduction <add>, %47, %cst_13 [2] : vector<8x8x64xf32> to vector<8x8xf32>
    %cst_14 = arith.constant 0.000000e+00 : f32
    %49 = vector.broadcast %cst_14 : f32 to vector<8x120xf32>
    %50 = tpu.concatenate %48, %49 in 1 : vector<8x8xf32>, vector<8x120xf32> -> vector<8x128xf32>
    %c0_15 = arith.constant 0 : index
    %c0_16 = arith.constant 0 : index
    %51 = vector.load %arg7[%c0_15, %c0_16] : memref<8x128xf32, #tpu.memory_space<vmem>>, vector<8x128xf32>
    tpu.vector_store %arg7[%c0_15, %c0_16], %50 {strides = array<i32>} : memref<8x128xf32, #tpu.memory_space<vmem>>, vector<8x128xf32>,
    return
  }
  func.func @transform_0(%arg0: i32) -> (i32, i32) {
    %c0_i32 = arith.constant 0 : i32
    %c0_i32_0 = arith.constant 0 : i32
    return %arg0, %c0_i32 : i32, i32
  }
  func.func @transform_1(%arg0: i32) -> (i32, i32) {
    %c0_i32 = arith.constant 0 : i32
    %c0_i32_0 = arith.constant 0 : i32
    return %arg0, %c0_i32 : i32, i32
  }
  func.func @transform_2(%arg0: i32) -> (i32, i32) {
    %c0_i32 = arith.constant 0 : i32
    %c0_i32_0 = arith.constant 0 : i32
    return %arg0, %c0_i32 : i32, i32
  }
  func.func @transform_3(%arg0: i32) -> (i32, i32) {
    %c0_i32 = arith.constant 0 : i32
    %c0_i32_0 = arith.constant 0 : i32
    %c0_i32_1 = arith.constant 0 : i32
    return %c0_i32, %c0_i32_0 : i32, i32
  }
  func.func @transform_4(%arg0: i32) -> (i32, i32) {
    %c0_i32 = arith.constant 0 : i32
    %c0_i32_0 = arith.constant 0 : i32
    %c0_i32_1 = arith.constant 0 : i32
    return %c0_i32, %c0_i32_0 : i32, i32
  }
  func.func @transform_5(%arg0: i32) -> (i32, i32) {
    %c0_i32 = arith.constant 0 : i32
    %c0_i32_0 = arith.constant 0 : i32
    %c0_i32_1 = arith.constant 0 : i32
    return %c0_i32, %c0_i32_0 : i32, i32
  }
  func.func @transform_6(%arg0: i32) -> (i32, i32) {
    %c0_i32 = arith.constant 0 : i32
    %c0_i32_0 = arith.constant 0 : i32
    return %arg0, %c0_i32 : i32, i32
  }
}

</mosaic_0001>

<bundles_post_ra>
// kernel: tpu_custom_call.1
= control target key start
LH: loop header
LB: loop body
LE: loop exit
PB: predicated region body
PF: predicated region fallthrough
CT: control target
= control target key end

     0   :  { %s2010_s0 = inlined_call_operand.hbm [shape: s32[16,1], index: 0, kind: input, shape index: {}]   ;;  %s2011_s1 = inlined_call_operand.hbm [shape: s32[16,4], index: 1, kind: input, shape index: {}]   ;;  %s2012_s2 = inlined_call_operand.hbm [shape: s32[16,8], index: 2, kind: input, shape index: {}]   ;;  %s2013_s3 = inlined_call_operand.hbm [shape: f32[16,32], index: 3, kind: input, shape index: {}]   ;;  %s2014_s4 = inlined_call_operand.hbm [shape: f32[64,32], index: 4, kind: input, shape index: {}]   ;;  %s2015_s5 = inlined_call_operand.hbm [shape: f32[32,64], index: 5, kind: input, shape index: {}]   ;;  %s2016_s6 = inlined_call_operand.hbm [shape: f32[16,128], index: 6, kind: output, shape index: {}]  }
   0x1   :  { %2039 = sst [smem:[#allocation24_spill]] %s2011_s1 }
   0x2   :  { %2040 = sst [smem:[#allocation25_spill]] %s2013_s3 }
   0x3   :  { %11 = vsyncpa [#allocation3], 0 }
   0x4   :  { %13 = vsyncpa [#allocation3 + $0x1], 0 }
   0x5   :  { %14 = vsyncpa [#allocation6], 0 }
   0x6   :  { %16 = vsyncpa [#allocation6 + $0x1], 0 }
   0x7   :  { %17 = vsyncpa [#allocation9], 0 }
   0x8   :  { %18 = vsyncpa [#allocation12], 0 }
   0x9   :  { %19 = vsyncpa [#allocation4], 0 }
   0xa   :  { %21 = vsyncpa [#allocation4 + $0x1], 0  ;;  %s1597_s21 = smov 0   ;;  %s1599_s22 = smov 0  }
   0xb   :  { %s1601_s23 = smov 0   ;;  %s1603_s24 = smov 0  }
   0xc LB: > { %2041 = sst [smem:[#allocation19_spill]] %s1531_s21  ;;  %s1618_s25 = sadd.s32 4294967295, %s1543_s24   ;;  %s1543_s24 = sphi %s1603_s24, %s2077_s24   ;;  %s1539_s23 = sphi %s1601_s23, %s2081_s23   ;;  %s1535_s22 = sphi %s1599_s22, %s2080_s22   ;;  %s1531_s21 = sphi %s1597_s21, %s2079_s21  }
   0xd   : > { %2042 = sst [smem:[#allocation20_spill]] %s1543_s24  ;;  %s1072_s26 = sadd.s32 4294967294, %s1543_s24  }
   0xe   : > { %p47_p0 = scmp.ne.s32.totalorder %s1535_s22, %s1531_s21  ;;  %p2017_p1 = scmp.eq.s32.totalorder %s1618_s25, 0 }
   0xf   : > { %p192_p3 = scmp.eq.s32.totalorder %s1072_s26, 1  ;;  %p1073_p5 = scmp.ge.s32.totalorder %s1543_s24, 1 }
  0x10   : > { %p1627_p4 = por %p2017_p1, %p47_p0  ;;  %p199_p7 = scmp.lt.s32.totalorder %s1543_s24, 3 }
  0x11   : > { %p1632_p6 = por %p192_p3, %p47_p0  ;;  %s1545_s30 = smov [#allocation8]  }
  0x12   : > { %s2043_s27 = scalar_select %p1627_p4, 1, 0 }
  0x13   : > { %s2044_s28 = scalar_select %p1632_p6, 1, 0 }
  0x14   : > { %p1637_p8 = pnand %p1073_p5, %p199_p7  ;;  %s211_s7 = sshll.u32 %s1545_s30, 4  ;;  %s1641_s7 = int_to_ptr.vmem [resolvable:$true] %s211_s7 }
  0x15   : > { %2045 = sst [smem:[#allocation21_spill]] %s2044_s28  ;;  %s1653_s9 = sadd.s32 1, %s1543_s24  }
  0x16   : > { %s2046_s29 = scalar_select %p1637_p8, 1, 0 }
  0x17   : > { %p1208_p9 = pneg %p1637_p8  ;;  %2048 = sst [smem:[#allocation22_spill]] %s1653_s9 }
  0x18   : > { %s34_s10 = sadd.s32 1, %s1539_s23  ;;  %s31_s11 = ssub.s32 %s1543_s24, %s1653_s9 }
  0x19   : > { %p1648_p11 = pnand %p1208_p9, %p2017_p1  ;;  %s2049_s3 = sld [smem:[#allocation25_spill]] }
  0x1b   : > { %s2047_s8 = scalar_select %p1648_p11, 1, 0 }
  0x1c   : > { %p1666_p13 = pneg %p1648_p11 }
  0x1e   : > { %s2050_s17 = scalar_select %p1666_p13, 1, 0 }
  0x1f   : > { %s1291_s14 = scalar_lea.hbm %s2049_s3, 256 }
  0x20   : > { %p1292_p12 = scmp.ne.s32.totalorder %s2049_s3, %s1291_s14  ;;  %p1298_p5 = scmp.lt.u32.totalorder %s1291_s14, %s2049_s3 }
  0x22   : > { %p1294_p0 = pnand %p1666_p13, %p1292_p12 }
  0x24   : > { %p1295_p3 = pneg %p1294_p0 }
  0x26   : > { %p1300_p7 = pnand %p1298_p5, %p1295_p3 }
  0x28   : > { %1303 = shalt.err (!%p1300_p7)
}
  0x29   : > { %s1304_s20 = scalar_lea.vmem %s1641_s7, 256  ;;  %p1312_p2 = scmp.lt.s32.totalorder %s1641_s7, %s1641_s7 }
  0x2a   : > { %p1305_p9 = scmp.ne.s32.totalorder %s1641_s7, %s1304_s20  ;;  %p1313_p6 = scmp.lt.s32.totalorder %s1304_s20, %s1304_s20 }
  0x2c   : > { %p1307_p10 = pnand %p1305_p9, %p1666_p13  ;;  %p1314_p12 = por %p1313_p6, %p1312_p2 }
  0x2e   : > { %p1308_p1 = pneg %p1307_p10 }
  0x30   : > { %p1315_p0 = pnand %p1314_p12, %p1308_p1 }
  0x32   : > { %1318 = shalt.err (!%p1315_p0)
}
  0x33   : > { %s2018_s26 = smov 128   ;;  %s2021_s30 = smov 8  }
  0x34   : > { %1211 = dma.hbm_to_vmem [thread:$0]  (!%p1648_p11), %s2049_s3, 256, %s1641_s7, [#allocation9], %s2018_s26, %s2018_s26, %s2021_s30  }
  0x35   : > { %p32_p1 = scmp.eq.s32.totalorder %s31_s11, 0  ;;  %p41_p2 = scmp.ne.s32.totalorder %s1539_s23, %s1535_s22 }
  0x36   : > { %p42_p6 = scmp.eq.s32.totalorder %s1543_s24, 0  ;;  %p1235_p10 = scmp.lt.s32.totalorder %s1543_s24, 2 }
  0x37   : > { %s1695_s14 = scalar_select %p32_p1, %s1539_s23, %s34_s10  }
  0x38   : > { %p43_p3 = por %p42_p6, %p41_p2  ;;  %p2052_p5 = scmp.eq.s32.totalorder %s1618_s25, 1 }
  0x39   : > { %2051 = sst [smem:[#allocation23_spill]] %s1695_s14  ;;  %s2020_s16 = sand.u32 1, %s1539_s23  }
  0x3a   : > { %p1699_p7 = por %p2052_p5, %p41_p2  ;;  %s1705_s18 = sshll.u32 %s1543_s24, 7 }
  0x3b   : > { %s1709_s19 = sshll.u32 %s2020_s16, 3  ;;  %p1711_p9 = pnand %p1235_p10, %p43_p3 }
  0x3c   : > { %s2053_s15 = scalar_select %p1699_p7, 1, 0 }
  0x3d   : > { %s2054_s7 = scalar_select %p1711_p9, 1, 0 }
  0x3e   : > { %s269_s10 = sand.u32 1, %s1543_s24   ;;  %s2055_s1 = sld [smem:[#allocation24_spill]] }
  0x3f   : > { %s273_s13 = scalar_lea.vmem [#allocation5], %s1709_s19  ;;  %s1725_s16 = scalar_lea.sflag [#allocation6], %s269_s10 }
  0x40   : > { %s280_s26 = sshll.u32 %s273_s13, 4  ;;  %p1731_p0 = pneg %p1711_p9  ;;  %s1723_s26 = int_to_ptr.vmem [resolvable:$true] %s280_s26 }
  0x42   : > { %s2056_s3 = scalar_select %p1731_p0, 1, 0 }
  0x44   : > { %s1720_s12 = scalar_lea.hbm %s2055_s1, %s1705_s18  ;;  %s1324_s14 = scalar_lea.hbm %s2055_s1, 256 }
  0x45   : > { %s1319_s30 = scalar_lea.hbm %s1720_s12, 128  ;;  %p1325_p6 = scmp.lt.u32.totalorder %s1720_s12, %s2055_s1 }
  0x46   : > { %p1320_p12 = scmp.ne.s32.totalorder %s1720_s12, %s1319_s30  ;;  %p1326_p10 = scmp.lt.u32.totalorder %s1324_s14, %s1319_s30 }
  0x47   : > { %p1328_p5 = scmp.lt.u32.totalorder %s1319_s30, %s1720_s12 }
  0x48   : > { %p1322_p1 = pnand %p1731_p0, %p1320_p12  ;;  %p1327_p3 = por %p1326_p10, %p1325_p6 }
  0x4a   : > { %p1323_p2 = pneg %p1322_p1  ;;  %p1329_p7 = por %p1328_p5, %p1327_p3 }
  0x4c   : > { %p1330_p4 = pnand %p1329_p7, %p1323_p2 }
  0x4e   : > { %1333 = shalt.err (!%p1330_p4)
}
  0x4f   : > { %s1334_s10 = scalar_lea.vmem %s1723_s26, 128  ;;  %s1548_s11 = smov [#allocation5]  }
  0x50   : > { %p1335_p12 = scmp.ne.s32.totalorder %s1723_s26, %s1334_s10  ;;  %s1339_s20 = sshll.u32 %s1548_s11, 4  ;;  %s1340_s20 = int_to_ptr.vmem [resolvable:$false] %s1339_s20 }
  0x51   : > { %s1341_s9 = scalar_lea.vmem %s1340_s20, 256  ;;  %p1342_p11 = scmp.lt.s32.totalorder %s1723_s26, %s1340_s20 }
  0x52   : > { %p1337_p1 = pnand %p1335_p12, %p1731_p0  ;;  %p1343_p13 = scmp.lt.s32.totalorder %s1341_s9, %s1334_s10 }
  0x54   : > { %p1338_p8 = pneg %p1337_p1  ;;  %p1344_p6 = por %p1343_p13, %p1342_p11 }
  0x56   : > { %p1345_p10 = pnand %p1344_p6, %p1338_p8 }
  0x58   : > { %1348 = shalt.err (!%p1345_p10)
}
  0x59   : > { %1224 = dma.hbm_to_vmem [thread:$0]  (!%p1711_p9), %s1720_s12, 128, %s1723_s26, %s1725_s16  }
  0x5a   : > { %s1549_s30 = smov [#allocation10]   ;;  %s1550_s13 = smov [#allocation11]  }
  0x5b   : > { %s224_s14 = sshll.u32 %s1549_s30, 4  ;;  %s237_s1 = sshll.u32 %s1550_s13, 4  ;;  %s225_s14 = int_to_ptr.vmem [resolvable:$true] %s224_s14  ;;  %s238_s1 = int_to_ptr.vmem [resolvable:$true] %s237_s1 }
  0x5c   : > { %s1349_s20 = scalar_lea.hbm %s2014_s4, 1024  ;;  %p2057_p8 = scmp.ne.s32.totalorder %s2050_s17, 0 }
  0x5d   : > { %p1350_p4 = scmp.ne.s32.totalorder %s2014_s4, %s1349_s20  ;;  %p1356_p7 = scmp.lt.u32.totalorder %s1349_s20, %s2014_s4 }
  0x5f   : > { %p1352_p11 = pnand %p1350_p4, %p2057_p8 }
  0x61   : > { %p1353_p13 = pneg %p1352_p11 }
  0x63   : > { %p1358_p2 = pnand %p1356_p7, %p1353_p13 }
  0x65   : > { %1361 = shalt.err (!%p1358_p2)
}
  0x66   : > { %s1362_s26 = scalar_lea.vmem %s225_s14, 1024  ;;  %p1370_p1 = scmp.lt.s32.totalorder %s225_s14, %s225_s14 }
  0x67   : > { %p1363_p3 = scmp.ne.s32.totalorder %s225_s14, %s1362_s26  ;;  %p1371_p6 = scmp.lt.s32.totalorder %s1362_s26, %s1362_s26 }
  0x69   : > { %p1365_p5 = pnand %p1363_p3, %p2057_p8  ;;  %p1372_p10 = por %p1371_p6, %p1370_p1 }
  0x6b   : > { %p1366_p12 = pneg %p1365_p5 }
  0x6d   : > { %p1373_p9 = pnand %p1372_p10, %p1366_p12 }
  0x6f   : > { %1376 = shalt.err (!%p1373_p9)
}
  0x70   : > { %p2058_p4 = scmp.ne.s32.totalorder %s2047_s8, 0  ;;  %s2059_s24 = smov 8  }
  0x71   : > { %s2060_s12 = smov 128   ;;  %s1377_s11 = scalar_lea.hbm %s2015_s5, 512 }
  0x72   : > { %1214 = dma.hbm_to_vmem [thread:$0]  (!%p2058_p4), %s2014_s4, 1024, %s225_s14, [#allocation9], %s2060_s12, %s2060_s12, %s2059_s24  }
  0x73   : > { %p1378_p11 = scmp.ne.s32.totalorder %s2015_s5, %s1377_s11  ;;  %p1384_p7 = scmp.lt.u32.totalorder %s1377_s11, %s2015_s5 }
  0x75   : > { %p1380_p9 = pnand %p1378_p11, %p2057_p8 }
  0x77   : > { %p1381_p13 = pneg %p1380_p9 }
  0x79   : > { %p1386_p2 = pnand %p1384_p7, %p1381_p13 }
  0x7b   : > { %1389 = shalt.err (!%p1386_p2)
}
  0x7c   : > { %s1390_s21 = scalar_lea.vmem %s238_s1, 512  ;;  %p1398_p1 = scmp.lt.s32.totalorder %s238_s1, %s238_s1 }
  0x7d   : > { %p1391_p3 = scmp.ne.s32.totalorder %s238_s1, %s1390_s21  ;;  %p1399_p6 = scmp.lt.s32.totalorder %s1390_s21, %s1390_s21 }
  0x7f   : > { %p1393_p5 = pnand %p1391_p3, %p2057_p8  ;;  %p1400_p10 = por %p1399_p6, %p1398_p1 }
  0x81   : > { %p1394_p12 = pneg %p1393_p5 }
  0x83   : > { %p1401_p0 = pnand %p1400_p10, %p1394_p12 }
  0x85   : > { %1404 = shalt.err (!%p1401_p0)
}
  0x86   : > { %1217 = dma.hbm_to_vmem [thread:$0]  (!%p2058_p4), %s2015_s5, 512, %s238_s1, [#allocation12], %s2060_s12, %s2060_s12, %s2059_s24  }
  0x87   : > { %s1801_s13 = scalar_lea.hbm %s2010_s0, %s1705_s18  ;;  %s255_s8 = scalar_lea.vmem [#allocation2], %s1709_s19 }
  0x88   : > { %s262_s11 = sshll.u32 %s255_s8, 4  ;;  %s1810_s9 = scalar_lea.hbm %s2012_s2, %s1705_s18  ;;  %s1804_s11 = int_to_ptr.vmem [resolvable:$true] %s262_s11 }
  0x89   : > { %s2061_s26 = sand.u32 1, %s1539_s23   ;;  %s1405_s24 = scalar_lea.hbm %s1801_s13, 128 }
  0x8a   : > { %s252_s1 = scalar_lea.sflag [#allocation3], %s2061_s26  ;;  %p1406_p0 = scmp.ne.s32.totalorder %s1801_s13, %s1405_s24 }
  0x8b   : > { %p2062_p8 = scmp.ne.s32.totalorder %s2056_s3, 0  ;;  %s1410_s14 = scalar_lea.hbm %s2010_s0, 256 }
  0x8c   : > { %p1411_p9 = scmp.lt.u32.totalorder %s1801_s13, %s2010_s0  ;;  %p1412_p13 = scmp.lt.u32.totalorder %s1410_s14, %s1405_s24 }
  0x8d   : > { %p1408_p4 = pnand %p1406_p0, %p2062_p8  ;;  %p1414_p2 = scmp.lt.u32.totalorder %s1405_s24, %s1801_s13 }
  0x8e   : > { %p1413_p7 = por %p1412_p13, %p1411_p9 }
  0x8f   : > { %p1409_p11 = pneg %p1408_p4 }
  0x90   : > { %p1415_p3 = por %p1414_p2, %p1413_p7 }
  0x92   : > { %p1416_p5 = pnand %p1415_p3, %p1409_p11 }
  0x94   : > { %1419 = shalt.err (!%p1416_p5)
}
  0x95   : > { %s1420_s18 = scalar_lea.vmem %s1804_s11, 128  ;;  %s1551_s30 = smov [#allocation2]  }
  0x96   : > { %p1421_p12 = scmp.ne.s32.totalorder %s1804_s11, %s1420_s18  ;;  %s1425_s8 = sshll.u32 %s1551_s30, 4  ;;  %s1426_s8 = int_to_ptr.vmem [resolvable:$false] %s1425_s8 }
  0x97   : > { %s1427_s20 = scalar_lea.vmem %s1426_s8, 256  ;;  %p1428_p10 = scmp.lt.s32.totalorder %s1804_s11, %s1426_s8 }
  0x98   : > { %p1423_p1 = pnand %p1421_p12, %p2062_p8  ;;  %p1429_p0 = scmp.lt.s32.totalorder %s1427_s20, %s1420_s18 }
  0x9a   : > { %p1424_p6 = pneg %p1423_p1  ;;  %p1430_p4 = por %p1429_p0, %p1428_p10 }
  0x9c   : > { %p1431_p9 = pnand %p1430_p4, %p1424_p6 }
  0x9e   : > { %1434 = shalt.err (!%p1431_p9)
}
  0x9f   : > { %p2063_p11 = scmp.ne.s32.totalorder %s2054_s7, 0  ;;  %s291_s10 = scalar_lea.vmem [#allocation7], %s1709_s19 }
  0xa0   : > { %s298_s26 = sshll.u32 %s291_s10, 4  ;;  %s1435_s24 = scalar_lea.hbm %s1810_s9, 128  ;;  %s299_s26 = int_to_ptr.vmem [resolvable:$true] %s298_s26 }
  0xa1   : > { %1221 = dma.hbm_to_vmem [thread:$0]  (!%p2063_p11), %s1801_s13, 128, %s1804_s11, %s252_s1  }
  0xa2   : > { %p1436_p13 = scmp.ne.s32.totalorder %s1810_s9, %s1435_s24  ;;  %s1440_s14 = scalar_lea.hbm %s2012_s2, 256 }
  0xa3   : > { %p1441_p3 = scmp.lt.u32.totalorder %s1810_s9, %s2012_s2  ;;  %p1442_p5 = scmp.lt.u32.totalorder %s1440_s14, %s1435_s24 }
  0xa4   : > { %p1438_p7 = pnand %p1436_p13, %p2062_p8  ;;  %p1444_p1 = scmp.lt.u32.totalorder %s1435_s24, %s1810_s9 }
  0xa5   : > { %p1443_p12 = por %p1442_p5, %p1441_p3 }
  0xa6   : > { %p1439_p2 = pneg %p1438_p7 }
  0xa7   : > { %p1445_p6 = por %p1444_p1, %p1443_p12 }
  0xa9   : > { %p1446_p10 = pnand %p1445_p6, %p1439_p2 }
  0xab   : > { %1449 = shalt.err (!%p1446_p10)
}
  0xac   : > { %s1450_s19 = scalar_lea.vmem %s299_s26, 128  ;;  %s1552_s13 = smov [#allocation7]  }
  0xad   : > { %p1451_p0 = scmp.ne.s32.totalorder %s299_s26, %s1450_s19  ;;  %s1455_s11 = sshll.u32 %s1552_s13, 4  ;;  %s1456_s11 = int_to_ptr.vmem [resolvable:$false] %s1455_s11 }
  0xae   : > { %s1457_s1 = scalar_lea.vmem %s1456_s11, 256  ;;  %p1458_p13 = scmp.lt.s32.totalorder %s299_s26, %s1456_s11 }
  0xaf   : > { %p1453_p4 = pnand %p1451_p0, %p2062_p8  ;;  %p1459_p7 = scmp.lt.s32.totalorder %s1457_s1, %s1450_s19 }
  0xb1   : > { %p1454_p9 = pneg %p1453_p4  ;;  %p1460_p11 = por %p1459_p7, %p1458_p13 }
  0xb3   : > { %p1461_p3 = pnand %p1460_p11, %p1454_p9 }
  0xb5   : > { %1464 = shalt.err (!%p1461_p3)
}
  0xb6   : > { %p2064_p5 = scmp.ne.s32.totalorder %s2054_s7, 0  ;;  %p2065_p2 = scmp.ne.s32.totalorder %s2046_s29, 0 }
  0xb7   : > { %s1857_s3 = sand.u32 (!%p2065_p2), 1, %s1535_s22   ;;  %p2066_p8 = scmp.ne.s32.totalorder (!%p2065_p2), %s2043_s27, 0 }
  0xb8   : > { %1227 = dma.hbm_to_vmem [thread:$0]  (!%p2064_p5), %s1810_s9, 128, %s299_s26, %s1725_s16  }
  0xb9   : > { %307 = sbr.rel (%p2065_p2) target bundleno = 958 (0x3be), region = 44  ;;  %s1860_s18 = sshll.u32 (!%p2065_p2), %s1857_s3, 3 }
  0xba   : > { %s310_s30 = scalar_lea.sflag (!%p2065_p2), [#allocation3], %s1857_s3  ;;  %s313_s8 = scalar_lea.vmem (!%p2065_p2), [#allocation2], %s1860_s18 }
  0xc0   : > { %1510 = dma.done.wait (%p2066_p8), %s310_s30, 128  }
  0xc1   : > { %1512 = vsyncadd (%p2066_p8), %s310_s30, 4294967168  ;;  %s318_s29 = sand.u32 1, %s1618_s25   ;;  %s322_s7 = scalar_lea.vmem [#allocation5], %s1860_s18 }
  0xc2   : > { %s319_s16 = scalar_lea.sflag [#allocation6], %s318_s29 }
  0xc3   : > { %1514 = dma.done.wait (%p2066_p8), %s319_s16, 256  }
  0xc4   : > { %1516 = vsyncadd (%p2066_p8), %s319_s16, 4294967040  ;;  %s331_s9 = scalar_lea.vmem [#allocation7], %s1860_s18  ;;  %p2067_p11 = scmp.eq.s32.totalorder %s1618_s25, 0 }
  0xc6   : > { %1518 = dma.done.wait (%p2067_p11), [#allocation9], 1280   ;;  %p2068_p12 = pmov %p2067_p11 }
  0xc7   : > { %p2069_p1 = pmov %p2067_p11 }
  0xc8   : > { %1520 = vsyncadd (%p2068_p12), [#allocation9], 4294966016 }
  0xc9   : > { %1522 = dma.done.wait (%p2069_p1), [#allocation12], 512   ;;  %p2070_p6 = pmov %p2069_p1 }
  0xca   : > { %v1553_v0 = vmov 2   ;;  %v1554_v1 = vmov 0   ;;  %v1555_v2 = vmov 0.0|0.0   ;;  %v393_v3 = vld [vmem:[%s322_s7] sm:$0xff]  ;;  %v421_v4 = vld [vmem:[#allocation10] sm:$0xff]  ;;  %v422_v5 = vld [vmem:[#allocation10 + $0x8] sm:$0xff]  ;;  %v383_v23 = vlaneseq }
  0xcb   : > { %1524 = vsyncadd (%p2070_p6), [#allocation12], 4294966784  ;;  %1287 = vset.pattern.permute.xlu1 %v1553_v0  ;;  %1285 = vset.pattern.permute.xlu0 %v1554_v1  ;;  %v423_v6 = vld [vmem:[#allocation10 + $0x10] sm:$0xff]  ;;  %v424_v7 = vld [vmem:[#allocation10 + $0x18] sm:$0xff]  ;;  %v1167_v8 = vpack.c.bf16 %v422_v5, %v421_v4  ;;  %v1556_v10 = vmov 3   ;;  %v1557_v11 = vmov 1  }
  0xcc   : > { %1166 = vmatprep.subr.bf16.mxu0 %v1555_v2  ;;  %1178 = vmatprep.subr.bf16.mxu1 %v1555_v2  ;;  %v1170_v9 = vpack.c.bf16 %v424_v7, %v423_v6  ;;  %v425_v12 = vld [vmem:[#allocation10 + $0x20] sm:$0xff]  ;;  %v426_v13 = vld [vmem:[#allocation10 + $0x28] sm:$0xff]  ;;  %v391_v14 = vld [vmem:[#allocation8] sm:$0xff]  ;;  %vm1558_vm0 = vmmov 0   ;;  %v1559_v22 = vmov 0.0   ;;  %v1895_v24 = vand.u32 127, %v383_v23 }
  0xcd   : > { %408 = vperm.xlu1 %1287, %v393_v3   ;;  %395 = vperm.xlu0 %1285, %v393_v3   ;;  %v392_v15 = vld [vmem:[#allocation8 + $0x8] sm:$0xff]  ;;  %v382_v16 = vld [vmem:[%s313_s8] sm:$0xff]  ;;  %v1173_v17 = vpack.c.bf16 %v426_v13, %v425_v12  ;;  %v427_v19 = vld [vmem:[#allocation10 + $0x30] sm:$0xff]  ;;  %vm503_vm5 = vcmask 130048   ;;  %vm429_vm7 = vcmask 523264   ;;  %v1911_v44 = vshrl.u32 %v383_v23, 7 }
  0xce   : > { %1168 = vmatpush3.bf16.msra.mxu0 %v1167_v8  ;;  %v1179_v18 = vpack.c.bf16 %v392_v15, %v391_v14  ;;  %v428_v20 = vld [vmem:[#allocation10 + $0x38] sm:$0xff]  ;;  %1152 = vmatprep.mubr.msk.f32.mxu1 %vm1558_vm0, %v1559_v22  ;;  %v577_v31 = vld [vmem:[#allocation11] sm:$0xff]  ;;  %v578_v32 = vld [vmem:[#allocation11 + $0x8] sm:$0xff]  ;;  %vm581_vm8 = vcmask 261120   ;;  %v1560_v4 = vmov 1966171168  }
  0xcf   : > { %1169 = vmatprep.subr.bf16.mxu0 %v1555_v2  ;;  %v1176_v21 = vpack.c.bf16 %v428_v20, %v427_v19  ;;  %1145 = vmatprep.mubr.msk.f32.mxu0 %vm1558_vm0, %v1559_v22  ;;  %v1182_v37 = vpack.c.bf16 %v578_v32, %v577_v31  ;;  %v579_v41 = vld [vmem:[#allocation11 + $0x10] sm:$0xff]  ;;  %v580_v42 = vld [vmem:[#allocation11 + $0x18] sm:$0xff]  ;;  %v655_v45 = vld [vmem:[%s331_s9] sm:$0xff]  ;;  %v1916_v46 = vsub.s32 0, %v1911_v44  ;;  %v665_v47 = vsub.s32 1, %v1911_v44  ;;  %s1109_s27 = sshll.u32 %s1618_s25, 7 }
  0xd0   : > { %1180 = vmatpush3.bf16.msra.mxu1 %v1179_v18  ;;  %v1185_v43 = vpack.c.bf16 %v580_v42, %v579_v41  ;;  %v672_v48 = vsub.s32 2, %v1911_v44  ;;  %v679_v49 = vsub.s32 3, %v1911_v44  ;;  %v686_v54 = vsub.s32 4, %v1911_v44  ;;  %s381_s20 = scalar_lea.vmem [#allocation13], %s1860_s18  ;;  %s1966_s12 = scalar_lea.hbm %s2016_s6, %s1109_s27 }
  0xd1   : > { %1288 = vset.pattern.permute.xlu1 %v1556_v10  ;;  %1286 = vset.pattern.permute.xlu0 %v1557_v11  ;;  %v659_v50 = vrot.slane %v655_v45, %v1916_v46  ;;  %v666_v51 = vrot.slane %v655_v45, %v665_v47  ;;  %v693_v55 = vsub.s32 5, %v1911_v44  ;;  %v700_v58 = vsub.s32 6, %v1911_v44  ;;  %s930_s10 = sshll.u32 %s381_s20, 4  ;;  %s917_s21 = scalar_lea.sflag [#allocation4], %s1857_s3  ;;  %s1968_s10 = int_to_ptr.vmem [resolvable:$true] %s930_s10 }
  0xd2   : > { %415 = vperm.xlu1 %1288, %v393_v3   ;;  %401 = vperm.xlu0 %1286, %v393_v3   ;;  %v673_v52 = vrot.slane %v655_v45, %v672_v48  ;;  %v680_v53 = vrot.slane %v655_v45, %v679_v49  ;;  %v687_v56 = vrot.slane %v655_v45, %v686_v54  ;;  %v707_v59 = vsub.s32 7, %v1911_v44  ;;  %s1465_s25 = scalar_lea.vmem %s1968_s10, 128  ;;  %p2071_p0 = scmp.ne.s32.totalorder %s2053_s15, 0 }
  0xd3   : > { %1171 = vmatpush3.bf16.msra.mxu0 %v1170_v9  ;;  %1181 = vmatprep.subr.bf16.mxu1 %v1555_v2  ;;  %v694_v57 = vrot.slane %v655_v45, %v693_v55  ;;  %v701_v60 = vrot.slane %v655_v45, %v700_v58  ;;  %v739_v5 = vunpack.c.l.s4 %v1560_v4  ;;  %p1466_p10 = scmp.ne.s32.totalorder %s1968_s10, %s1465_s25  ;;  %s1561_s14 = smov [#allocation13]  }
  0xd4   : > { %1172 = vmatprep.subr.bf16.mxu0 %v1555_v2  ;;  %v708_v61 = vrot.slane %v655_v45, %v707_v59  ;;  %s1469_s28 = sshll.u32 %s1561_s14, 4  ;;  %s1470_s28 = int_to_ptr.vmem [resolvable:$false] %s1469_s28 }
  0xd5   : > { %v740_v6 = vunpack.c.0.s8 %v739_v5  ;;  %p1467_p4 = pnand %p1466_p10, %p2071_p0  ;;  %s1471_s17 = scalar_lea.vmem %s1470_s28, 256 }
  0xd6   : > { %1289 = vset.pattern.permute.xlu1 %v1554_v1  ;;  %1290 = vset.pattern.permute.xlu0 %v1556_v10  ;;  %p1472_p13 = scmp.lt.s32.totalorder %s1968_s10, %s1470_s28  ;;  %p1473_p7 = scmp.lt.s32.totalorder %s1471_s17, %s1465_s25 }
  0xd7   : > { %386 = vperm.xlu1 %1289, %v382_v16   ;;  %1174 = vmatpush3.bf16.msra.mxu0 %v1173_v17  ;;  %v743_v9 = vsub.s32 %v740_v6, %v1911_v44  ;;  %p1468_p9 = pneg %p1467_p4 }
  0xd8   : > { %1175 = vmatprep.subr.bf16.mxu0 %v1555_v2  ;;  %661 = vbcast.lane.b32.xlu0 %v659_v50, 256  ;;  %p1474_p3 = por %p1473_p7, %p1472_p13 }
  0xda   : > { %p1475_p5 = pnand %p1474_p3, %p1468_p9 }
  0xdb   : > { %1177 = vmatpush3.bf16.msra.mxu0 %v1176_v21  ;;  %668 = vbcast.lane.b32.xlu1 %v666_v51, 256 }
  0xdc   : > { %675 = vbcast.lane.b32.xlu0 %v673_v52, 256 }
  0xdf   : > { %682 = vbcast.lane.b32.xlu1 %v680_v53, 256 }
  0xe0   : > { %689 = vbcast.lane.b32.xlu0 %v687_v56, 256 }
  0xe3   : > { %696 = vbcast.lane.b32.xlu1 %v694_v57, 256 }
  0xe4   : > { %703 = vbcast.lane.b32.xlu0 %v701_v60, 256 }
  0xe7   : > { %710 = vbcast.lane.b32.xlu1 %v708_v61, 256 }
 0x14c   : > { %v396_v25 = vpop.permute.xlu0 %395  ;;  %v409_v26 = vpop.permute.xlu1 %408 }
 0x14d   : > { %vm397_vm1 = vcmp.eq.s32.totalorder %v396_v25, %v1895_v24  ;;  %vm410_vm2 = vcmp.eq.s32.totalorder %v409_v26, %v1895_v24 }
 0x14e   : > { %v1093_v29 = vsel %vm397_vm1, 1.0, %v1559_v22  ;;  %v1095_v34 = vsel %vm410_vm2, 1.0, %v1559_v22  ;;  %vm898_vm1 = vcmask 1041409   ;;  %vm900_vm2 = vcmask 1042434  }
 0x151   : > { %v402_v27 = vpop.permute.xlu0 %401  ;;  %v416_v28 = vpop.permute.xlu1 %415 }
 0x152   : > { %vm403_vm3 = vcmp.eq.s32.totalorder %v402_v27, %v1895_v24  ;;  %vm417_vm4 = vcmp.eq.s32.totalorder %v416_v28, %v1895_v24 }
 0x153   : > { %v1094_v30 = vsel %vm403_vm3, 1.0, %v1559_v22  ;;  %v1096_v38 = vsel %vm417_vm4, 1.0, %v1559_v22  ;;  %vm902_vm3 = vcmask 1043459   ;;  %vm904_vm4 = vcmask 1044484  }
 0x154   : > { %v406_v33 = vadd.f32 %v1094_v30, %v1093_v29 }
 0x155   : > { %v662_v3 = vpop.permute.xlu0 %661 }
 0x156   : > { %v413_v35 = vadd.f32 %v1095_v34, %v406_v33  ;;  %v387_v36 = vpop.permute.xlu1 %386  ;;  %vm712_vm9 = vcmp.eq.s32.totalorder %v662_v3, %v1895_v24  ;;  %v868_v3 = vsub.s32 %v1895_v24, %v1911_v44 }
 0x157   : > { %vm388_vm6 = vcmp.eq.s32.totalorder %v387_v36, %v1895_v24  ;;  %v1100_v19 = vsel %vm712_vm9, 1.0, %v1559_v22 }
 0x158   : > { %v420_v39 = vadd.f32 %v1096_v38, %v413_v35  ;;  %v1092_v40 = vsel %vm388_vm6, 1.0, %v1559_v22  ;;  %vm908_vm6 = vcmask 1046534  }
 0x159   : > { %1153 = vmatmul.mubr.msk.f32.vlgmr.msra.gmra.mrb[0].mxu1 %vm503_vm5, %v1092_v40  ;;  %v676_v7 = vpop.permute.xlu0 %675  ;;  %vm906_vm5 = vcmask 1045509  }
 0x15a   : > { %1146 = vmatmul.mubr.msk.f32.vlgmr.msra.gmra.mrb[0].mxu0 %vm429_vm7, %v420_v39  ;;  %1183 = vmatpush3.bf16.msra.mxu1 %v1182_v37  ;;  %v669_v8 = vpop.permute.xlu1 %668  ;;  %vm714_vm11 = vcmp.eq.s32.totalorder %v676_v7, %v1895_v24 }
 0x15b   : > { %1184 = vmatprep.subr.bf16.mxu1 %v1555_v2  ;;  %1163 = vmatprep.mubr.msk.f32.mxu1 %vm1558_vm0, %v1559_v22  ;;  %vm713_vm10 = vcmp.eq.s32.totalorder %v669_v8, %v1895_v24  ;;  %v1102_v26 = vsel %vm714_vm11, 1.0, %v1559_v22 }
 0x15c   : > { %v1101_v25 = vsel %vm713_vm10, 1.0, %v1559_v22 }
 0x15d   : > { %v690_v11 = vpop.permute.xlu0 %689 }
 0x15e   : > { %1186 = vmatpush3.bf16.msra.mxu1 %v1185_v43  ;;  %v683_v15 = vpop.permute.xlu1 %682  ;;  %vm716_vm12 = vcmp.eq.s32.totalorder %v690_v11, %v1895_v24 }
 0x15f   : > { %vm715_vm13 = vcmp.eq.s32.totalorder %v683_v15, %v1895_v24  ;;  %v1104_v35 = vsel %vm716_vm12, 1.0, %v1559_v22 }
 0x160   : > { %v1103_v43 = vsel %vm715_vm13, 1.0, %v1559_v22 }
 0x161   : > { %v704_v28 = vpop.permute.xlu0 %703 }
 0x162   : > { %v697_v30 = vpop.permute.xlu1 %696  ;;  %vm718_vm14 = vcmp.eq.s32.totalorder %v704_v28, %v1895_v24 }
 0x163   : > { %vm717_vm15 = vcmp.eq.s32.totalorder %v697_v30, %v1895_v24  ;;  %v1106_v49 = vsel %vm718_vm14, 1.0, %v1559_v22 }
 0x164   : > { %v1105_v55 = vsel %vm717_vm15, 1.0, %v1559_v22 }
 0x166   : > { %v711_v50 = vpop.permute.xlu1 %710 }
 0x167   : > { %vm719_vm0 = vcmp.eq.s32.totalorder %v711_v50, %v1895_v24 }
 0x168   : > { %v1107_v61 = vsel %vm719_vm0, 1.0, %v1559_v22 }
 0x22c   : > { %v573_v62 = vpop.f32.mrb[0].mxu1 }
 0x22d   : > { %v499_v63 = vpop.f32.mrb[0].mxu0  ;;  %v1154_v0 = vpop.f32.mrb[1].mxu1 }
 0x22e   : > { %v574_v1 = vadd.f32 %v573_v62, %v499_v63  ;;  %v1147_v2 = vpop.f32.mrb[1].mxu0 }
 0x230   : > { %1164 = vmatmul.mubr.msk.f32.vlgmr.msra.gmra.mrb[2].mxu1 %vm581_vm8, %v574_v1  ;;  %vm913_vm8 = vcmask 64512  }
 0x303   : > { %v651_v10 = vpop.f32.mrb[2].mxu1 }
 0x304   : > { %v737_v12 = vcombine.high %v651_v10, %v651_v10  ;;  %v744_v13 = vrot.slane %v651_v10, %v743_v9  ;;  %v1165_v14 = vpop.f32.mrb[3].mxu1 }
 0x306   : > { %v751_v16 = vrot.slane %v737_v12, %v743_v9  ;;  %v752_v17 = vcombine.high %v744_v13, %v744_v13  ;;  %v760_v18 = vrot.slane %v744_v13, %v743_v9 }
 0x308   : > { %v767_v20 = vrot.slane %v751_v16, %v743_v9  ;;  %v774_v21 = vrot.slane %v752_v17, %v743_v9  ;;  %v782_v23 = vcombine.high %v760_v18, %v760_v18  ;;  %v753_v27 = vcombine.high %v751_v16, %v751_v16 }
 0x309   : > { %v789_v29 = vrot.slane %v760_v18, %v1916_v46 }
 0x30a   : > { %v793_v31 = vrot.slane %v774_v21, %v1916_v46  ;;  %v797_v32 = vrot.slane %v782_v23, %v1916_v46  ;;  %v805_v33 = vrot.slane %v767_v20, %v1916_v46  ;;  %v784_v34 = vcombine.high %v774_v21, %v774_v21 }
 0x30b   : > { %v826_v36 = vmul.f32 %v1100_v19, %v789_v29  ;;  %v783_v37 = vcombine.high %v767_v20, %v767_v20  ;;  %v781_v42 = vrot.slane %v753_v27, %v743_v9 }
 0x30c   : > { %v827_v38 = vmul.f32 %v1101_v25, %v793_v31  ;;  %v828_v40 = vmul.f32 %v1102_v26, %v797_v32  ;;  %v801_v41 = vrot.slane %v784_v34, %v1916_v46  ;;  %v830_v47 = vmul.f32 %v1104_v35, %v805_v33 }
 0x30d   : > { %v834_v39 = vsel %vm429_vm7, %v826_v36, 0.0  ;;  %v813_v48 = vrot.slane %v783_v37, %v1916_v46  ;;  %v809_v53 = vrot.slane %v781_v42, %v1916_v46  ;;  %v785_v54 = vcombine.high %v781_v42, %v781_v42 }
 0x30e   : > { %835 = vadd.xlane.f32.xlu0 %v834_v39  ;;  %v837_v45 = vsel %vm429_vm7, %v827_v38, 0.0  ;;  %v840_v51 = vsel %vm429_vm7, %v828_v40, 0.0  ;;  %v829_v52 = vmul.f32 %v1103_v43, %v801_v41  ;;  %v846_v56 = vsel %vm429_vm7, %v830_v47, 0.0 }
 0x30f   : > { %838 = vadd.xlane.f32.xlu1 %v837_v45  ;;  %v832_v57 = vmul.f32 %v1106_v49, %v813_v48  ;;  %v831_v59 = vmul.f32 %v1105_v55, %v809_v53  ;;  %v817_v60 = vrot.slane %v785_v54, %v1916_v46 }
 0x310   : > { %v843_v58 = vsel %vm429_vm7, %v829_v52, 0.0 }
 0x311   : > { %v852_v62 = vsel %vm429_vm7, %v832_v57, 0.0  ;;  %v849_v63 = vsel %vm429_vm7, %v831_v59, 0.0  ;;  %v833_v0 = vmul.f32 %v1107_v61, %v817_v60 }
 0x312   : > { %841 = vadd.xlane.f32.xlu0 %v840_v51 }
 0x313   : > { %847 = vadd.xlane.f32.xlu1 %v846_v56  ;;  %v855_v1 = vsel %vm429_vm7, %v833_v0, 0.0  ;;  %vm910_vm7 = vcmask 1047559  }
 0x316   : > { %844 = vadd.xlane.f32.xlu0 %v843_v58 }
 0x317   : > { %853 = vadd.xlane.f32.xlu1 %v852_v62 }
 0x31a   : > { %850 = vadd.xlane.f32.xlu0 %v849_v63 }
 0x31e   : > { %856 = vadd.xlane.f32.xlu0 %v855_v1 }
 0x39b   : > { %v836_v2 = vpop.xlane.xlu0 %835 }
 0x39c   : > { %v839_v4 = vpop.xlane.xlu1 %838  ;;  %v869_v22 = vrot.slane %v836_v2, %v868_v3 }
 0x39d   : > { %v873_v5 = vrot.slane %v839_v4, %v868_v3 }
 0x39f   : > { %v842_v46 = vpop.xlane.xlu0 %841  ;;  %v899_v7 = vsel %vm898_vm1, %v873_v5, %v869_v22 }
 0x3a0   : > { %v877_v6 = vrot.slane %v842_v46, %v868_v3  ;;  %v848_v8 = vpop.xlane.xlu1 %847 }
 0x3a1   : > { %v885_v13 = vrot.slane %v848_v8, %v868_v3 }
 0x3a2   : > { %v901_v11 = vsel %vm900_vm2, %v877_v6, %v899_v7 }
 0x3a3   : > { %v845_v9 = vpop.xlane.xlu0 %844 }
 0x3a4   : > { %v881_v10 = vrot.slane %v845_v9, %v868_v3  ;;  %v854_v44 = vpop.xlane.xlu1 %853 }
 0x3a5   : > { %v893_v17 = vrot.slane %v854_v44, %v868_v3 }
 0x3a6   : > { %v903_v12 = vsel %vm902_vm3, %v881_v10, %v901_v11 }
 0x3a7   : > { %v851_v24 = vpop.xlane.xlu0 %850  ;;  %v905_v15 = vsel %vm904_vm4, %v885_v13, %v903_v12 }
 0x3a8   : > { %v889_v14 = vrot.slane %v851_v24, %v868_v3 }
 0x3aa   : > { %v907_v16 = vsel %vm906_vm5, %v889_v14, %v905_v15 }
 0x3ab   : > { %v857_v18 = vpop.xlane.xlu0 %856  ;;  %v909_v20 = vsel %vm908_vm6, %v893_v17, %v907_v16 }
 0x3ac   : > { %v897_v19 = vrot.slane %v857_v18, %v868_v3 }
 0x3ae   : > { %v911_v21 = vsel %vm910_vm7, %v897_v19, %v909_v20 }
 0x3af   : > { %v914_v23 = vsel %vm913_vm8, %v911_v21, 0.0 }
 0x3b0   : > { %915 = vst [vmem:[%s381_s20] sm:$0xff] %v914_v23 }
 0x3b1   : > { %1478 = shalt.err (!%p1475_p5)
}
 0x3b2   : > { %s1479_s19 = scalar_lea.hbm %s1966_s12, 128  ;;  %s1483_s1 = scalar_lea.hbm %s2016_s6, 256 }
 0x3b3   : > { %p1480_p2 = scmp.ne.s32.totalorder %s1966_s12, %s1479_s19  ;;  %p1484_p12 = scmp.lt.u32.totalorder %s1966_s12, %s2016_s6 }
 0x3b4   : > { %p1485_p1 = scmp.lt.u32.totalorder %s1483_s1, %s1479_s19  ;;  %p1487_p10 = scmp.lt.u32.totalorder %s1479_s19, %s1966_s12 }
 0x3b5   : > { %p1481_p8 = pnand %p1480_p2, %p2071_p0 }
 0x3b6   : > { %p1486_p6 = por %p1485_p1, %p1484_p12 }
 0x3b7   : > { %p1482_p11 = pneg %p1481_p8 }
 0x3b8   : > { %p1488_p4 = por %p1487_p10, %p1486_p6 }
 0x3ba   : > { %p1489_p9 = pnand %p1488_p4, %p1482_p11 }
 0x3bc   : > { %1492 = shalt.err (!%p1489_p9)
}
 0x3bd   : > { %1206 = dma.vmem_to_hbm [thread:$0]  (%p2071_p0), %s1968_s10, 128, %s1966_s12, %s917_s21  }
 0x3be PF: > { %s2072_s30 = sld [smem:[#allocation19_spill]]  ;;  %s2073_s8 = sld [smem:[#allocation21_spill]] }
 0x3bf   : > { %s2074_s29 = sld [smem:[#allocation20_spill]] }
 0x3c4   : > { %s942_s16 = sand.u32 1, %s2072_s30   ;;  %p2075_p13 = scmp.ne.s32.totalorder %s2073_s8, 0 }
 0x3c5   : > { %p2076_p7 = scmp.ge.s32.totalorder %s2074_s29, 2  ;;  %s943_s7 = scalar_lea.sflag [#allocation4], %s942_s16 }
 0x3c7   : > { %p1229_p3 = pnand %p2076_p7, %p2075_p13 }
 0x3c9   : > { %1526 = dma.done.wait (!%p1229_p3), %s943_s7, 128  }
 0x3ca   : > { %1528 = vsyncadd (!%p1229_p3), %s943_s7, 4294967168  ;;  %s2077_s24 = sld [smem:[#allocation22_spill]]  ;;  %s2078_s9 = sld [smem:[#allocation23_spill]] }
 0x3cb   : > { %s2079_s21 = smov %s1535_s22  ;;  %s2080_s22 = smov %s1539_s23 }
 0x3d0   : > { %p24_p5 = scmp.ge.s32.totalorder %s2077_s24, 4   ;;  %s2081_s23 = smov %s2078_s9 }
 0x3d2   :  { %26 = sbr.rel (!%p24_p5) target bundleno = 12 (0xc), region = 125 }
 0x3d9   :  { %948 = vsyncpa [#allocation3], 1 }
 0x3da   :  { %950 = vsyncpa [#allocation3 + $0x1], 1 }
 0x3db   :  { %951 = vsyncpa [#allocation6], 1 }
 0x3dc   :  { %953 = vsyncpa [#allocation6 + $0x1], 1 }
 0x3dd   :  { %954 = vsyncpa [#allocation9], 1 }
 0x3de   :  { %955 = vsyncpa [#allocation12], 1 }
 0x3df   :  { %956 = vsyncpa [#allocation4], 1 }
 0x3e0   :  { %958 = vsyncpa [#allocation4 + $0x1], 1 }

</bundles_post_ra>
